<compile_context>
chip_gen: v7x
topology: tpu7x:2x2x1
jax: 0.10.0
libtpu: 0.0.40
codegen_flags: <defaults>
</compile_context>

<pallas_src>
import functools

import jax
import jax.numpy as jnp
from jax.experimental import pallas as pl
from jax.experimental.pallas import tpu as pltpu


def _round_up(x, m):
    return ((x + m - 1) // m) * m


def _nconv_kernel(at_ref, x_ref, o_ref, *, precision):
    # at_ref: (Wp, V) resident; x_ref: (V, TN); o_ref: (Wp, TN)
    # Single lane-dense MXU matmul per grid step, f32 accumulation.
    o_ref[...] = jnp.dot(
        at_ref[...],
        x_ref[...],
        preferred_element_type=jnp.float32,
        precision=precision,
    ).astype(o_ref.dtype)


def nconv(
    x,
    A,
    *,
    lane_tile=2048,
    compute_dtype=None,
    out_dtype=None,
    precision=None,
    vmem_tile_budget_bytes=12 * 1024 * 1024,
):
    """out[n,c,w,l] = sum_v x[n,c,v,l] * A[v,w].   x: (N,C,V,L), A: (V,W)."""
    N, C, V, L = x.shape
    V2, W = A.shape
    assert V2 == V, f"A first dim {V2} must match x node dim {V}"
    if lane_tile <= 0 or lane_tile % 128 != 0:
        raise ValueError("lane_tile must be a positive multiple of 128")

    # Optional narrow-dtype compute at the call boundary (f32 accumulation).
    cdt = jnp.dtype(compute_dtype) if compute_dtype is not None else x.dtype
    x = x.astype(cdt)
    A = A.astype(cdt)
    odt = jnp.dtype(out_dtype) if out_dtype is not None else cdt

    M = N * C * L                      # flattened (batch, channel, seq) axis
    itemsize = jnp.dtype(cdt).itemsize
    W_pad = _round_up(W, 8)            # full-sublane (unmasked) output stores

    # --- lane-tile selection ------------------------------------------------
    def _working_set(t):
        # double-buffered x / out tiles + (double-buffered) resident A^T,
        # using lane-padded extents.
        x_tile = V * t
        o_tile = W_pad * t
        at_buf = W_pad * _round_up(V, 128)
        return (2 * (x_tile + o_tile) + 2 * at_buf) * itemsize

    tn = min(lane_tile, _round_up(M, 128))
    while tn > 128 and _working_set(tn) > vmem_tile_budget_bytes:
        tn = max(128, _round_up(tn // 2, 128))

    num_steps = pl.cdiv(M, tn)
    if num_steps < 2 and M > 128:
        # Keep >= 2 grid steps so v7x can shard the "parallel" axis over its
        # two TensorCores.
        tn = _round_up(pl.cdiv(M, 2), 128)
        num_steps = pl.cdiv(M, tn)

    # --- layout plumbing (one fused XLA copy per side, see TODO above) ------
    xm = jnp.transpose(x, (2, 0, 1, 3)).reshape(V, M)     # (V, M)
    at = jnp.transpose(A)                                  # (W, V), tiny
    if W_pad != W:
        at = jnp.pad(at, ((0, W_pad - W), (0, 0)))

    cost = pl.CostEstimate(
        flops=2 * M * V * W,
        transcendentals=0,
        bytes_accessed=itemsize * (V * M + V * W) + jnp.dtype(odt).itemsize * W * M,
    )
    vmem_limit = int(
        min(64 * 1024 * 1024, max(32 * 1024 * 1024, 2 * _working_set(tn)))
    )

    out2d = pl.pallas_call(
        functools.partial(_nconv_kernel, precision=precision),
        out_shape=jax.ShapeDtypeStruct((W_pad, M), odt),
        grid_spec=pltpu.PrefetchScalarGridSpec(
            num_scalar_prefetch=0,
            grid=(num_steps,),
            in_specs=[
                # A^T: full array, constant block index -> resident in VMEM.
                # TODO(synk): pipeline_mode=pl.Buffered(1) would drop its
                # redundant second buffer; negligible at these sizes.
                pl.BlockSpec((W_pad, V), lambda j: (0, 0)),
                # x: one lane tile of the flattened (V, N*C*L) matrix per step.
                pl.BlockSpec((V, tn), lambda j: (0, j)),
            ],
            out_specs=pl.BlockSpec((W_pad, tn), lambda j: (0, j)),
        ),
        compiler_params=pltpu.CompilerParams(
            dimension_semantics=("parallel",),
            vmem_limit_bytes=vmem_limit,
        ),
        cost_estimate=cost,
    )(at, xm)

    # Single fused output pass: drop the W sublane padding, un-flatten the
    # lane axis and put W ahead of L.  (Result is contiguous, matching the
    # PyTorch .contiguous().)
    out = out2d[:W].reshape(W, N, C, L).transpose(1, 2, 0, 3)
    return out


def nconv_ref(x, A):
    # Near-exact f32 reference.
    return jnp.einsum("ncvl,vw->ncwl", x, A, precision=jax.lax.Precision.HIGHEST)


if __name__ == "__main__":
    key = jax.random.PRNGKey(0)
    kx, ka, ka2 = jax.random.split(key, 3)

    # Small GraphWaveNet-flavoured shapes: batch=4, channels=4, nodes V=W=16,
    # seq L=12 (GraphWaveNet's receptive field).  M = N*C*L = 192, which
    # exercises both the >=2-step grid split and the ragged last lane block.
    N, C, V, L = 4, 4, 16, 12
    W = V

    x = jax.random.normal(kx, (N, C, V, L), dtype=jnp.float32)
    A = jax.random.normal(ka, (V, W), dtype=jnp.float32)
    ref = nconv_ref(x, A)

    # 1) Default path: keeps the caller's f32 dtype.  Tolerance is sized for
    #    default-precision MXU behaviour (possible bf16 truncation of f32
    #    operands, f32 accumulation); pass precision=jax.lax.Precision.HIGHEST
    #    for strict PyTorch-f32 parity.
    out = jax.block_until_ready(nconv(x, A))
    assert out.shape == (N, C, W, L) and out.dtype == x.dtype
    assert jnp.allclose(out, ref, atol=1.5e-1, rtol=5e-2)

    # 2) bf16 compute path (halves HBM bytes; f32 accumulation in the MXU).
    out_bf16 = jax.block_until_ready(nconv(x, A, compute_dtype=jnp.bfloat16))
    assert out_bf16.shape == (N, C, W, L) and out_bf16.dtype == jnp.bfloat16
    assert jnp.allclose(out_bf16.astype(jnp.float32), ref, atol=2.5e-1, rtol=5e-2)

    # 3) Rectangular A with W not a multiple of 8: exercises the A^T sublane
    #    padding and the pad-row drop in the output pass.
    W2 = 12
    A2 = jax.random.normal(ka2, (V, W2), dtype=jnp.float32)
    out2 = jax.block_until_ready(nconv(x, A2))
    assert out2.shape == (N, C, W2, L)
    assert jnp.allclose(out2, nconv_ref(x, A2), atol=1.5e-1, rtol=5e-2)

    print("KERNEL_OK")
</pallas_src>

<mosaic_0001>
module attributes {stable_mosaic.version = 11 : i64} {
  func.func @_nconv_kernel(%arg0: i32, %arg1: memref<16x16xf32, #tpu.memory_space<vmem>>, %arg2: memref<16x128xf32, #tpu.memory_space<vmem>>, %arg3: memref<16x128xf32, #tpu.memory_space<vmem>>) attributes {dimension_semantics = [#tpu.dimension_semantics<parallel>], iteration_bounds = array<i64: 2>, scalar_prefetch = 0 : i64, scratch_operands = 0 : i64, tpu.core_type = #tpu.core_type<tc>, window_params = [{pipeline_mode = #tpu.pipeline_mode<synchronous>, transform_indices = @transform_0, window_bounds = array<i64: 16, 16>}, {transform_indices = @transform_1, window_bounds = array<i64: 16, 128>}, {transform_indices = @transform_2, window_bounds = array<i64: 16, 128>}]} {
    %c0 = arith.constant 0 : index
    %c0_0 = arith.constant 0 : index
    %0 = vector.load %arg1[%c0, %c0_0] : memref<16x16xf32, #tpu.memory_space<vmem>>, vector<16x16xf32>
    %c0_1 = arith.constant 0 : index
    %c0_2 = arith.constant 0 : index
    %1 = vector.load %arg2[%c0_1, %c0_2] : memref<16x128xf32, #tpu.memory_space<vmem>>, vector<16x128xf32>
    %cst = arith.constant dense<0.000000e+00> : vector<16x128xf32>
    %2 = tpu.matmul %0, %1, %cst {dimension_numbers = #tpu.dot_dimension_numbers<[1], [0], [0], [1], [0, 0, 1, 1], [], []>} : vector<16x16xf32>, vector<16x128xf32>, vector<16x128xf32> -> vector<16x128xf32>
    %c0_3 = arith.constant 0 : index
    %c0_4 = arith.constant 0 : index
    %3 = vector.load %arg3[%c0_3, %c0_4] : memref<16x128xf32, #tpu.memory_space<vmem>>, vector<16x128xf32>
    tpu.vector_store %arg3[%c0_3, %c0_4], %2 {strides = array<i32>} : memref<16x128xf32, #tpu.memory_space<vmem>>, vector<16x128xf32>,
    return
  }
  func.func @transform_0(%arg0: i32) -> (i32, i32) {
    %c0_i32 = arith.constant 0 : i32
    %c0_i32_0 = arith.constant 0 : i32
    %c0_i32_1 = arith.constant 0 : i32
    return %c0_i32, %c0_i32_0 : i32, i32
  }
  func.func @transform_1(%arg0: i32) -> (i32, i32) {
    %c0_i32 = arith.constant 0 : i32
    %c0_i32_0 = arith.constant 0 : i32
    return %c0_i32, %arg0 : i32, i32
  }
  func.func @transform_2(%arg0: i32) -> (i32, i32) {
    %c0_i32 = arith.constant 0 : i32
    %c0_i32_0 = arith.constant 0 : i32
    return %c0_i32, %arg0 : i32, i32
  }
}

</mosaic_0001>

<bundles_post_ra>
// kernel: tpu_custom_call.1
= control target key start
LH: loop header
LB: loop body
LE: loop exit
PB: predicated region body
PF: predicated region fallthrough
CT: control target
= control target key end

     0   :  { %7 = vsyncpa [#allocation3], 0  ;;  %s815_s0 = inlined_call_operand.hbm [shape: f32[16,16], index: 0, kind: input, shape index: {}]   ;;  %s816_s1 = inlined_call_operand.hbm [shape: f32[16,192], index: 1, kind: input, shape index: {}]   ;;  %s817_s2 = inlined_call_operand.hbm [shape: f32[16,192], index: 2, kind: output, shape index: {}]  }
   0x1   :  { %8 = vsyncpa [#allocation6], 0 }
   0x2   :  { %10 = vsyncpa [#allocation6 + $0x1], 0 }
   0x3   :  { %11 = vsyncpa [#allocation4], 0 }
   0x4   :  { %13 = vsyncpa [#allocation4 + $0x1], 0  ;;  %s610_s9 = smov 0   ;;  %s612_s10 = smov 0  }
   0x5   :  { %s614_s11 = smov 0   ;;  %s616_s12 = smov 0  }
   0x6 LB: > { %s631_s13 = sadd.s32 4294967295, %s584_s12   ;;  %s362_s14 = sadd.s32 4294967294, %s584_s12   ;;  %s584_s12 = sphi %s616_s12, %s841_s12   ;;  %s580_s11 = sphi %s614_s11, %s840_s11   ;;  %s576_s10 = sphi %s612_s10, %s839_s10   ;;  %s572_s9 = sphi %s610_s9, %s838_s9  }
   0x7   : > { %s635_s15 = sadd.s32 1, %s584_s12   ;;  %s47_s16 = sadd.s32 1, %s580_s11 }
   0x8   : > { %s44_s17 = ssub.s32 %s584_s12, %s635_s15  ;;  %p54_p0 = scmp.ne.s32.totalorder %s580_s11, %s576_s10 }
   0x9   : > { %p45_p1 = scmp.eq.s32.totalorder %s44_s17, 0  ;;  %p55_p2 = scmp.eq.s32.totalorder %s584_s12, 0 }
   0xa   : > { %p60_p3 = scmp.ne.s32.totalorder %s576_s10, %s572_s9  ;;  %p818_p4 = scmp.eq.s32.totalorder %s631_s13, 0 }
   0xb   : > { %s647_s18 = scalar_select %p45_p1, %s580_s11, %s47_s16  }
   0xc   : > { %p649_p5 = por %p55_p2, %p54_p0  ;;  %p655_p6 = por %p818_p4, %p60_p3 }
   0xd   : > { %p84_p7 = scmp.eq.s32.totalorder %s631_s13, 1  ;;  %p90_p8 = scmp.eq.s32.totalorder %s362_s14, 1 }
   0xe   : > { %s822_s19 = scalar_select %p649_p5, 1, 0 }
   0xf   : > { %s823_s20 = scalar_select %p655_p6, 1, 0 }
  0x10   : > { %p363_p9 = scmp.ge.s32.totalorder %s584_s12, 1  ;;  %p97_p10 = scmp.lt.s32.totalorder %s584_s12, 3 }
  0x11   : > { %p662_p11 = por %p84_p7, %p54_p0  ;;  %p666_p12 = por %p90_p8, %p60_p3 }
  0x12   : > { %p670_p13 = pnand %p363_p9, %p97_p10  ;;  %s586_s24 = smov [#allocation2]  }
  0x13   : > { %s824_s21 = scalar_select %p662_p11, 1, 0 }
  0x14   : > { %s825_s22 = scalar_select %p666_p12, 1, 0 }
  0x15   : > { %s826_s23 = scalar_select %p670_p13, 1, 0 }
  0x16   : > { %p401_p1 = pneg %p670_p13  ;;  %s109_s25 = sshll.u32 %s586_s24, 4  ;;  %s110_s25 = int_to_ptr.vmem [resolvable:$true] %s109_s25 }
  0x17   : > { %s123_s27 = sand.u32 1, %s580_s11   ;;  %s456_s30 = scalar_lea.hbm %s815_s0, 256 }
  0x18   : > { %p678_p2 = pnand %p401_p1, %p818_p4  ;;  %p457_p7 = scmp.ne.s32.totalorder %s815_s0, %s456_s30 }
  0x19   : > { %p463_p1 = scmp.lt.u32.totalorder %s456_s30, %s815_s0 }
  0x1a   : > { %p458_p8 = pneg %p678_p2 }
  0x1c   : > { %p459_p9 = pnand %p458_p8, %p457_p7 }
  0x1e   : > { %p460_p10 = pneg %p459_p9 }
  0x20   : > { %p465_p4 = pnand %p463_p1, %p460_p10 }
  0x22   : > { %468 = shalt.err (!%p465_p4)
}
  0x23   : > { %s469_s7 = scalar_lea.vmem %s110_s25, 256  ;;  %p477_p11 = scmp.lt.s32.totalorder %s110_s25, %s110_s25 }
  0x24   : > { %p470_p0 = scmp.ne.s32.totalorder %s110_s25, %s469_s7  ;;  %p478_p6 = scmp.lt.s32.totalorder %s469_s7, %s469_s7 }
  0x26   : > { %p472_p3 = pnand %p470_p0, %p458_p8  ;;  %p479_p13 = por %p478_p6, %p477_p11 }
  0x28   : > { %p473_p12 = pneg %p472_p3 }
  0x2a   : > { %p480_p5 = pnand %p479_p13, %p473_p12 }
  0x2c   : > { %483 = shalt.err (!%p480_p5)
}
  0x2d   : > { %s587_s8 = smov 128   ;;  %s588_s14 = smov 8  }
  0x2e   : > { %404 = dma.hbm_to_vmem [thread:$0]  (!%p678_p2), %s815_s0, 256, %s110_s25, [#allocation3], %s587_s8, %s587_s8, %s588_s14  }
  0x2f   : > { %p828_p4 = scmp.ne.s32.totalorder %s822_s19, 0  ;;  %p829_p0 = scmp.lt.s32.totalorder %s584_s12, 2 }
  0x30   : > { %s366_s28 = sshll.u32 %s123_s27, 4  ;;  %s367_s29 = sshll.u32 %s584_s12, 7 }
  0x31   : > { %p708_p3 = pnand %p829_p0, %p828_p4  ;;  %s716_s26 = scalar_lea.hbm %s816_s1, %s367_s29 }
  0x32   : > { %s127_s25 = scalar_lea.vmem [#allocation5], %s366_s28  ;;  %s720_s4 = scalar_lea.sflag [#allocation6], %s123_s27 }
  0x33   : > { %s133_s19 = sshll.u32 %s127_s25, 4  ;;  %s484_s5 = scalar_lea.hbm %s716_s26, 256  ;;  %s718_s19 = int_to_ptr.vmem [resolvable:$true] %s133_s19 }
  0x34   : > { %p485_p5 = scmp.ne.s32.totalorder %s716_s26, %s484_s5  ;;  %p486_p6 = pneg %p708_p3 }
  0x35   : > { %s489_s16 = scalar_lea.hbm %s816_s1, 512  ;;  %p490_p13 = scmp.lt.u32.totalorder %s716_s26, %s816_s1 }
  0x36   : > { %p487_p11 = pnand %p486_p6, %p485_p5  ;;  %p491_p2 = scmp.lt.u32.totalorder %s489_s16, %s484_s5 }
  0x37   : > { %p493_p8 = scmp.lt.u32.totalorder %s484_s5, %s716_s26 }
  0x38   : > { %p488_p12 = pneg %p487_p11  ;;  %p492_p7 = por %p491_p2, %p490_p13 }
  0x3a   : > { %p494_p9 = por %p493_p8, %p492_p7 }
  0x3c   : > { %p495_p10 = pnand %p494_p9, %p488_p12 }
  0x3e   : > { %498 = shalt.err (!%p495_p10)
}
  0x3f   : > { %s499_s27 = scalar_lea.vmem %s718_s19, 256  ;;  %s589_s28 = smov [#allocation5]  }
  0x40   : > { %p500_p1 = scmp.ne.s32.totalorder %s718_s19, %s499_s27  ;;  %s504_s30 = sshll.u32 %s589_s28, 4  ;;  %s505_s30 = int_to_ptr.vmem [resolvable:$false] %s504_s30 }
  0x41   : > { %s506_s3 = scalar_lea.vmem %s505_s30, 512  ;;  %p507_p5 = scmp.lt.s32.totalorder %s718_s19, %s505_s30 }
  0x42   : > { %p502_p4 = pnand %p500_p1, %p486_p6  ;;  %p508_p11 = scmp.lt.s32.totalorder %s506_s3, %s499_s27 }
  0x44   : > { %p503_p0 = pneg %p502_p4  ;;  %p509_p13 = por %p508_p11, %p507_p5 }
  0x46   : > { %p510_p2 = pnand %p509_p13, %p503_p0 }
  0x48   : > { %513 = shalt.err (!%p510_p2)
}
  0x49   : > { %s590_s25 = smov 256   ;;  %p831_p6 = scmp.ne.s32.totalorder %s826_s23, 0 }
  0x4a   : > { %408 = dma.hbm_to_vmem [thread:$0]  (!%p708_p3), %s716_s26, 256, %s718_s19, %s720_s4, %s590_s25, %s587_s8, %s588_s14  }
  0x4b   : > { %145 = sbr.rel (%p831_p6) target bundleno = 323 (0x143), region = 28  ;;  %p832_p12 = scmp.eq.s32.totalorder (!%p831_p6), %s631_s13, 0 }
  0x52   : > { %559 = dma.done.wait (%p832_p12), [#allocation3], 256   ;;  %p833_p7 = pmov %p832_p12 }
  0x53   : > { %s757_s5 = sand.u32 1, %s576_s10   ;;  %p834_p8 = scmp.ne.s32.totalorder %s823_s20, 0 }
  0x54   : > { %561 = vsyncadd (%p833_p7), [#allocation3], 4294967040  ;;  %s370_s24 = sshll.u32 %s757_s5, 4  ;;  %s152_s6 = scalar_lea.sflag [#allocation6], %s757_s5 }
  0x55   : > { %s155_s7 = scalar_lea.vmem [#allocation5], %s370_s24 }
  0x56   : > { %563 = dma.done.wait (%p834_p8), %s152_s6, 256  }
  0x57   : > { %565 = vsyncadd (%p834_p8), %s152_s6, 4294967040  ;;  %vm180_vm0 = vcmask 130048   ;;  %v178_v0 = vld [vmem:[%s155_s7] sm:$0xff]  ;;  %v179_v1 = vld [vmem:[%s155_s7 + $0x8] sm:$0xff]  ;;  %s175_s23 = scalar_lea.vmem [#allocation7], %s370_s24  ;;  %s375_s14 = sshll.u32 %s631_s13, 7 }
  0x58   : > { %v176_v2 = vld [vmem:[#allocation2] sm:$0xff]  ;;  %v389_v3 = vpack.c.bf16 %v179_v1, %v178_v0  ;;  %v177_v4 = vld [vmem:[#allocation2 + $0x8] sm:$0xff]  ;;  %s277_s8 = sshll.u32 %s175_s23, 4  ;;  %s771_s19 = scalar_lea.hbm %s817_s2, %s375_s14  ;;  %s766_s8 = int_to_ptr.vmem [resolvable:$true] %s277_s8 }
  0x59   : > { %386 = vmatprep.mubr.msk.f32.mxu0 %vm180_vm0, %v176_v2  ;;  %s265_s4 = scalar_lea.sflag [#allocation4], %s757_s5  ;;  %s514_s16 = scalar_lea.vmem %s766_s8, 256 }
  0x5a   : > { %390 = vmatprep.subr.bf16.mxu0 %v389_v3  ;;  %p515_p3 = scmp.ne.s32.totalorder %s766_s8, %s514_s16  ;;  %p835_p9 = scmp.ne.s32.totalorder %s824_s21, 0 }
  0x5b   : > { %392 = vmatpush3.bf16.msra.mxu0 %v389_v3  ;;  %s591_s13 = smov [#allocation7]  }
  0x5c   : > { %p516_p10 = pnand %p515_p3, %p835_p9  ;;  %s518_s17 = sshll.u32 %s591_s13, 4  ;;  %s519_s17 = int_to_ptr.vmem [resolvable:$false] %s518_s17 }
  0x5d   : > { %s520_s29 = scalar_lea.vmem %s519_s17, 512  ;;  %p521_p4 = scmp.lt.s32.totalorder %s766_s8, %s519_s17 }
  0x5e   : > { %387 = vmatmul.mubr.msk.f32.vlgmr.msra.gmra.mrb[0].mxu0 %vm180_vm0, %v177_v4  ;;  %p517_p1 = pneg %p516_p10  ;;  %p522_p0 = scmp.lt.s32.totalorder %s520_s29, %s514_s16 }
  0x60   : > { %p523_p5 = por %p522_p0, %p521_p4 }
  0x62   : > { %p524_p11 = pnand %p523_p5, %p517_p1 }
 0x131   : > { %v388_v5 = vpop.f32.mrb[0].mxu0 }
 0x132   : > { %263 = vst [vmem:[%s175_s23 + $0x8] sm:$0xff] %v388_v5  ;;  %v253_v6 = vpop.f32.mrb[1].mxu0 }
 0x133   : > { %262 = vst [vmem:[%s175_s23] sm:$0xff] %v253_v6 }
 0x134   : > { %527 = shalt.err (!%p524_p11)
}
 0x135   : > { %s528_s27 = scalar_lea.hbm %s771_s19, 256  ;;  %s532_s3 = scalar_lea.hbm %s817_s2, 512 }
 0x136   : > { %p529_p13 = scmp.ne.s32.totalorder %s771_s19, %s528_s27  ;;  %p533_p12 = scmp.lt.u32.totalorder %s771_s19, %s817_s2 }
 0x137   : > { %p534_p7 = scmp.lt.u32.totalorder %s532_s3, %s528_s27  ;;  %p536_p3 = scmp.lt.u32.totalorder %s528_s27, %s771_s19 }
 0x138   : > { %p530_p2 = pnand %p529_p13, %p835_p9 }
 0x139   : > { %p535_p8 = por %p534_p7, %p533_p12 }
 0x13a   : > { %p531_p6 = pneg %p530_p2 }
 0x13b   : > { %p537_p10 = por %p536_p3, %p535_p8 }
 0x13d   : > { %p538_p1 = pnand %p537_p10, %p531_p6 }
 0x13f   : > { %541 = shalt.err (!%p538_p1)
}
 0x140   : > { %s592_s6 = smov 128   ;;  %s593_s7 = smov 256  }
 0x141   : > { %s594_s23 = smov 8  }
 0x142   : > { %399 = dma.vmem_to_hbm [thread:$0]  (%p835_p9), %s766_s8, 256, %s771_s19, %s265_s4, %s592_s6, %s593_s7, %s594_s23  }
 0x143 PF: > { %s292_s14 = sand.u32 1, %s572_s9   ;;  %p836_p4 = scmp.ne.s32.totalorder %s825_s22, 0 }
 0x144   : > { %p837_p0 = scmp.ge.s32.totalorder %s584_s12, 2  ;;  %s293_s20 = scalar_lea.sflag [#allocation4], %s292_s14 }
 0x146   : > { %p410_p5 = pnand %p837_p0, %p836_p4 }
 0x148   : > { %567 = dma.done.wait (!%p410_p5), %s293_s20, 256  }
 0x149   : > { %569 = vsyncadd (!%p410_p5), %s293_s20, 4294967040  ;;  %p16_p11 = scmp.ge.s32.totalorder %s635_s15, 4   ;;  %s838_s9 = smov %s576_s10 }
 0x14a   : > { %s839_s10 = smov %s580_s11  ;;  %s840_s11 = smov %s647_s18 }
 0x14b   : > { %s841_s12 = smov %s635_s15  ;;  %18 = sbr.rel (!%p16_p11) target bundleno = 6 (0x6), region = 78 }
 0x152   :  { %298 = vsyncpa [#allocation3], 1 }
 0x153   :  { %300 = vsyncpa [#allocation3 + $0x1], 1 }
 0x154   :  { %301 = vsyncpa [#allocation6], 1 }
 0x155   :  { %303 = vsyncpa [#allocation6 + $0x1], 1 }
 0x156   :  { %304 = vsyncpa [#allocation4], 1 }
 0x157   :  { %306 = vsyncpa [#allocation4 + $0x1], 1 }

</bundles_post_ra>
